<compile_context>
chip_gen: v7x
topology: tpu7x:2x2x1
jax: 0.10.0
libtpu: 0.0.40
codegen_flags: <defaults>
</compile_context>

<pallas_src>
import jax
import jax.numpy as jnp
from jax.experimental import pallas as pl
from jax.experimental.pallas import tpu as pltpu


def _round_up(x, m):
    return ((x + m - 1) // m) * m


def random_pixels_kernel(seed_ref, x_ref, o_ref):
    tm, tnw = x_ref.shape  # block of uint32 words; each word = 4 image bytes

    # ---- scalar side: fold the seed into a single salt ---------------------
    seed = seed_ref[0].astype(jnp.uint32)
    salt = seed * jnp.uint32(0x9E3779B9)
    # Global word offset of this tile (int32; fine for any realistic image —
    # would overflow only beyond 2^31 words).
    base = pl.program_id(0) * (tm * tnw)

    # ---- one counter hash per 32-bit word (4 random bytes per hash) --------
    row = jax.lax.broadcasted_iota(jnp.int32, (tm, tnw), 0)
    col = jax.lax.broadcasted_iota(jnp.int32, (tm, tnw), 1)
    idx = (base + row * tnw + col).astype(jnp.uint32)   # unique global word id
    h = idx + salt
    h = h ^ (h >> 16)                      # full murmur3 fmix32 finalizer
    h = h * jnp.uint32(0x85EBCA6B)
    h = h ^ (h >> 13)
    h = h * jnp.uint32(0xC2B2AE35)
    h = h ^ (h >> 16)

    ones = jnp.uint32(0x01010101)
    highs = jnp.uint32(0x80808080)

    # Random bytes in [0, 255): remap any 0xFF hash byte to 0xFE.
    r255 = ((~h - ones) & h) & highs       # 0x80 where hash byte == 0xFF
    rnd = h - (r255 >> 7)                  # subtract 1 only from those bytes

    # ---- packed (SWAR) compare/select: 4 image bytes per uint32 lane -------
    w = x_ref[...]
    nw_ = ~w
    z_bg = ((w - ones) & nw_) & highs      # 0x80 where input byte == 0
    m_bg = (z_bg >> 7) * jnp.uint32(0xFF)  # 0xFF where input byte == 0
    z_ln = ((nw_ - ones) & w) & highs      # 0x80 where input byte == 255
    m_ln = (z_ln >> 7) * jnp.uint32(0xFF)  # 0xFF where input byte == 255

    # line bytes -> 0, background bytes -> random, others unchanged
    o_ref[...] = (w & ~(m_ln | m_bg)) | (rnd & m_bg)


def random_pixels(x, seed=0):
    """x: uint8 array of shape (H, W, 3). Returns uint8 array (H, W, 3)."""
    H, W, C = x.shape
    n = H * W * C
    flat = x.reshape(-1)                               # metadata-only

    # Pack bytes into 32-bit words.  The reshape is metadata-only and the
    # bitcast is a pure reinterpretation in XLA; padding (a real copy) only
    # happens in the rare n % 4 != 0 case.
    pad_b = (-n) % 4
    if pad_b:
        flat = jnp.pad(flat, (0, pad_b))
    nw = (n + pad_b) // 4
    words = jax.lax.bitcast_convert_type(flat.reshape(nw, 4), jnp.uint32)

    # Lane-dense 2-D word layout: prefer a width that divides the word count
    # exactly (metadata-only reshape, unmasked stores).  Fall back to padding
    # to a multiple of 128 words only when no width fits.
    TNW = next((t for t in (512, 256, 128) if nw % t == 0), None)
    if TNW is None:
        TNW = 128
        pad_w = (-nw) % TNW
        words = jnp.pad(words, (0, pad_w))
    R = words.shape[0] // TNW
    words2 = words.reshape(R, TNW)

    # Rows per block: ~1 MiB blocks, multiple of 8 sublanes (u32), and keep
    # the grid >= 2 steps when possible so v7x can shard over both TCs.
    tm_target = min(2048, max(8, (1 << 20) // (TNW * 4)))
    if R <= 8:
        TM = R                                         # full-dim block
    else:
        TM = min(tm_target, _round_up((R + 1) // 2, 8))
    grid = (pl.cdiv(R, TM),)

    seed_arr = jnp.asarray([seed], dtype=jnp.int32)

    out_words = pl.pallas_call(
        random_pixels_kernel,
        out_shape=jax.ShapeDtypeStruct((R, TNW), jnp.uint32),
        grid=grid,
        in_specs=[
            pl.BlockSpec(memory_space=pltpu.MemorySpace.SMEM),  # seed scalar
            pl.BlockSpec((TM, TNW), lambda i: (i, 0)),
        ],
        out_specs=pl.BlockSpec((TM, TNW), lambda i: (i, 0)),
        compiler_params=pltpu.CompilerParams(
            dimension_semantics=("parallel",),
            vmem_limit_bytes=32 * 1024 * 1024,
        ),
        cost_estimate=pl.CostEstimate(
            flops=0, transcendentals=0, bytes_accessed=2 * R * TNW * 4),
    )(seed_arr, words2)

    out_bytes = jax.lax.bitcast_convert_type(out_words, jnp.uint8).reshape(-1)
    if out_bytes.shape[0] != n:                        # only if we padded
        out_bytes = out_bytes[:n]
    # TODO(synk): transforms.ToPILImage() has no Pallas/JAX equivalent; the
    # uint8 HWC array returned here is the image payload.
    return out_bytes.reshape(H, W, C)


if __name__ == "__main__":
    def check(img, out):
        out_i = jnp.asarray(out, jnp.int32)
        in_i = jnp.asarray(img, jnp.int32)
        ok_line = bool(jnp.all(jnp.where(in_i == 255, out_i == 0, True)))
        ok_bg = bool(jnp.all(jnp.where(in_i == 0,
                                       (out_i >= 0) & (out_i < 255), True)))
        keep = (in_i != 0) & (in_i != 255)
        ok_keep = bool(jnp.all(jnp.where(keep, out_i == in_i, True)))
        return ok_line and ok_bg and ok_keep

    key = jax.random.PRNGKey(0)
    # Main shape exercises the metadata-only path + multi-step grid; the odd
    # shape exercises the padded fallback path.
    for (H, W, C) in [(128, 128, 3), (17, 13, 3)]:
        k, key = jax.random.split(key)
        img = jax.random.randint(k, (H, W, C), 1, 255, dtype=jnp.int32)
        img = img.at[0:4, :, :].set(255)   # line-colored region
        img = img.at[8:12, :, :].set(0)    # background-colored region
        img = img.astype(jnp.uint8)

        out = jax.block_until_ready(random_pixels(img, seed=1234))
        assert out.dtype == jnp.uint8 and out.shape == (H, W, C)
        assert check(img, out), f"mismatch for shape {(H, W, C)}"

    print("KERNEL_OK")
</pallas_src>

<mosaic_0001>
module attributes {stable_mosaic.version = 11 : i64} {
  func.func @random_pixels_kernel(%arg0: i32, %arg1: memref<1xi32, #tpu.memory_space<smem>>, %arg2: memref<16x512xi32, #tpu.memory_space<vmem>>, %arg3: memref<16x512xi32, #tpu.memory_space<vmem>>) attributes {dimension_semantics = [#tpu.dimension_semantics<parallel>], iteration_bounds = array<i64: 2>, scalar_prefetch = 0 : i64, scratch_operands = 0 : i64, tpu.core_type = #tpu.core_type<tc>, window_params = [{transform_indices = @transform_0, window_bounds = array<i64: 1>}, {transform_indices = @transform_1, window_bounds = array<i64: 16, 512>}, {transform_indices = @transform_2, window_bounds = array<i64: 16, 512>}]} {
    %c0 = arith.constant 0 : index
    %0 = memref.load %arg1[%c0] : memref<1xi32, #tpu.memory_space<smem>>
    %c-1640531527_i32 = arith.constant -1640531527 : i32
    %1 = arith.muli %0, %c-1640531527_i32 : i32
    %c8192_i32 = arith.constant 8192 : i32
    %2 = arith.muli %arg0, %c8192_i32 : i32
    %3 = tpu.iota {dimensions = array<i32: 0>} : vector<16x512xi32>
    %4 = tpu.iota {dimensions = array<i32: 1>} : vector<16x512xi32>
    %c512_i32 = arith.constant 512 : i32
    %5 = vector.broadcast %c512_i32 : i32 to vector<16x512xi32>
    %6 = arith.muli %3, %5 : vector<16x512xi32>
    %7 = vector.broadcast %2 : i32 to vector<16x512xi32>
    %8 = arith.addi %7, %6 : vector<16x512xi32>
    %9 = arith.addi %8, %4 : vector<16x512xi32>
    %10 = vector.broadcast %1 : i32 to vector<16x512xi32>
    %11 = arith.addi %9, %10 : vector<16x512xi32>
    %c16_i32 = arith.constant 16 : i32
    %12 = vector.broadcast %c16_i32 : i32 to vector<16x512xi32>
    %13 = arith.shrui %11, %12 : vector<16x512xi32>
    %14 = arith.xori %11, %13 : vector<16x512xi32>
    %c-2048144789_i32 = arith.constant -2048144789 : i32
    %15 = vector.broadcast %c-2048144789_i32 : i32 to vector<16x512xi32>
    %16 = arith.muli %14, %15 : vector<16x512xi32>
    %c13_i32 = arith.constant 13 : i32
    %17 = vector.broadcast %c13_i32 : i32 to vector<16x512xi32>
    %18 = arith.shrui %16, %17 : vector<16x512xi32>
    %19 = arith.xori %16, %18 : vector<16x512xi32>
    %c-1028477387_i32 = arith.constant -1028477387 : i32
    %20 = vector.broadcast %c-1028477387_i32 : i32 to vector<16x512xi32>
    %21 = arith.muli %19, %20 : vector<16x512xi32>
    %c16_i32_0 = arith.constant 16 : i32
    %22 = vector.broadcast %c16_i32_0 : i32 to vector<16x512xi32>
    %23 = arith.shrui %21, %22 : vector<16x512xi32>
    %24 = arith.xori %21, %23 : vector<16x512xi32>
    %cst = arith.constant dense<-1> : vector<16x512xi32>
    %25 = arith.xori %24, %cst : vector<16x512xi32>
    %c16843009_i32 = arith.constant 16843009 : i32
    %26 = vector.broadcast %c16843009_i32 : i32 to vector<16x512xi32>
    %27 = arith.subi %25, %26 : vector<16x512xi32>
    %28 = arith.andi %27, %24 : vector<16x512xi32>
    %c-2139062144_i32 = arith.constant -2139062144 : i32
    %29 = vector.broadcast %c-2139062144_i32 : i32 to vector<16x512xi32>
    %30 = arith.andi %28, %29 : vector<16x512xi32>
    %c7_i32 = arith.constant 7 : i32
    %31 = vector.broadcast %c7_i32 : i32 to vector<16x512xi32>
    %32 = arith.shrui %30, %31 : vector<16x512xi32>
    %33 = arith.subi %24, %32 : vector<16x512xi32>
    %c0_1 = arith.constant 0 : index
    %c0_2 = arith.constant 0 : index
    %34 = vector.load %arg2[%c0_1, %c0_2] : memref<16x512xi32, #tpu.memory_space<vmem>>, vector<16x512xi32>
    %cst_3 = arith.constant dense<-1> : vector<16x512xi32>
    %35 = arith.xori %34, %cst_3 : vector<16x512xi32>
    %c16843009_i32_4 = arith.constant 16843009 : i32
    %36 = vector.broadcast %c16843009_i32_4 : i32 to vector<16x512xi32>
    %37 = arith.subi %34, %36 : vector<16x512xi32>
    %38 = arith.andi %37, %35 : vector<16x512xi32>
    %c-2139062144_i32_5 = arith.constant -2139062144 : i32
    %39 = vector.broadcast %c-2139062144_i32_5 : i32 to vector<16x512xi32>
    %40 = arith.andi %38, %39 : vector<16x512xi32>
    %c7_i32_6 = arith.constant 7 : i32
    %41 = vector.broadcast %c7_i32_6 : i32 to vector<16x512xi32>
    %42 = arith.shrui %40, %41 : vector<16x512xi32>
    %c255_i32 = arith.constant 255 : i32
    %43 = vector.broadcast %c255_i32 : i32 to vector<16x512xi32>
    %44 = arith.muli %42, %43 : vector<16x512xi32>
    %c16843009_i32_7 = arith.constant 16843009 : i32
    %45 = vector.broadcast %c16843009_i32_7 : i32 to vector<16x512xi32>
    %46 = arith.subi %35, %45 : vector<16x512xi32>
    %47 = arith.andi %46, %34 : vector<16x512xi32>
    %c-2139062144_i32_8 = arith.constant -2139062144 : i32
    %48 = vector.broadcast %c-2139062144_i32_8 : i32 to vector<16x512xi32>
    %49 = arith.andi %47, %48 : vector<16x512xi32>
    %c7_i32_9 = arith.constant 7 : i32
    %50 = vector.broadcast %c7_i32_9 : i32 to vector<16x512xi32>
    %51 = arith.shrui %49, %50 : vector<16x512xi32>
    %c255_i32_10 = arith.constant 255 : i32
    %52 = vector.broadcast %c255_i32_10 : i32 to vector<16x512xi32>
    %53 = arith.muli %51, %52 : vector<16x512xi32>
    %54 = arith.ori %53, %44 : vector<16x512xi32>
    %cst_11 = arith.constant dense<-1> : vector<16x512xi32>
    %55 = arith.xori %54, %cst_11 : vector<16x512xi32>
    %56 = arith.andi %34, %55 : vector<16x512xi32>
    %57 = arith.andi %33, %44 : vector<16x512xi32>
    %58 = arith.ori %56, %57 : vector<16x512xi32>
    %c0_12 = arith.constant 0 : index
    %c0_13 = arith.constant 0 : index
    %59 = vector.load %arg3[%c0_12, %c0_13] : memref<16x512xi32, #tpu.memory_space<vmem>>, vector<16x512xi32>
    tpu.vector_store %arg3[%c0_12, %c0_13], %58 {strides = array<i32>} : memref<16x512xi32, #tpu.memory_space<vmem>>, vector<16x512xi32>,
    return
  }
  func.func @transform_0(%arg0: i32) -> i32 {
    %c0_i32 = arith.constant 0 : i32
    %c0_i32_0 = arith.constant 0 : i32
    return %c0_i32 : i32
  }
  func.func @transform_1(%arg0: i32) -> (i32, i32) {
    %c0_i32 = arith.constant 0 : i32
    %c0_i32_0 = arith.constant 0 : i32
    return %arg0, %c0_i32 : i32, i32
  }
  func.func @transform_2(%arg0: i32) -> (i32, i32) {
    %c0_i32 = arith.constant 0 : i32
    %c0_i32_0 = arith.constant 0 : i32
    return %arg0, %c0_i32 : i32, i32
  }
}

</mosaic_0001>

<bundles_post_ra>
// kernel: tpu_custom_call.1
= control target key start
LH: loop header
LB: loop body
LE: loop exit
PB: predicated region body
PF: predicated region fallthrough
CT: control target
= control target key end

     0   :  { %s1113_s0 = inlined_call_operand.<no memory space> [shape: s32[1], index: 0, kind: input, shape index: {}]   ;;  %s1114_s1 = inlined_call_operand.hbm [shape: u32[24,512], index: 1, kind: input, shape index: {}]   ;;  %s1115_s2 = inlined_call_operand.hbm [shape: u32[24,512], index: 2, kind: output, shape index: {}]  }
   0x1   :  { %7 = sst [smem:[#allocation2]] %s1113_s0 }
   0x2   :  { %8 = vsyncpa [#allocation4], 0 }
   0x3   :  { %10 = vsyncpa [#allocation4 + $0x1], 0 }
   0x4   :  { %11 = vsyncpa [#allocation5], 0 }
   0x5   :  { %13 = vsyncpa [#allocation5 + $0x1], 0  ;;  %s803_s11 = smov 0   ;;  %s805_s12 = smov 0  }
   0x6   :  { %s807_s13 = smov 0   ;;  %s809_s14 = smov 0  }
   0x7 LB: > { %s824_s0 = sadd.s32 4294967295, %s777_s14   ;;  %s567_s15 = sadd.s32 4294967294, %s777_s14   ;;  %s777_s14 = sphi %s809_s14, %s1125_s14   ;;  %s773_s13 = sphi %s807_s13, %s1124_s13   ;;  %s769_s12 = sphi %s805_s12, %s1123_s12   ;;  %s765_s11 = sphi %s803_s11, %s1122_s11  }
   0x8   : > { %s828_s16 = sadd.s32 1, %s777_s14   ;;  %s47_s17 = sadd.s32 1, %s773_s13 }
   0x9   : > { %s44_s18 = ssub.s32 %s777_s14, %s828_s16  ;;  %p54_p0 = scmp.ne.s32.totalorder %s773_s13, %s769_s12 }
   0xa   : > { %p45_p1 = scmp.eq.s32.totalorder %s44_s18, 0  ;;  %p55_p2 = scmp.eq.s32.totalorder %s777_s14, 0 }
   0xb   : > { %p60_p3 = scmp.ne.s32.totalorder %s769_s12, %s765_s11  ;;  %p61_p4 = scmp.eq.s32.totalorder %s824_s0, 0 }
   0xc   : > { %s840_s19 = scalar_select %p45_p1, %s773_s13, %s47_s17  }
   0xd   : > { %p56_p5 = por %p55_p2, %p54_p0  ;;  %p842_p6 = por %p61_p4, %p60_p3 }
   0xe   : > { %p84_p7 = scmp.eq.s32.totalorder %s824_s0, 1  ;;  %p90_p8 = scmp.eq.s32.totalorder %s567_s15, 1 }
   0xf   : > { %p1116_p11 = scmp.ge.s32.totalorder %s777_s14, 2 }
  0x10   : > { %p847_p9 = por %p84_p7, %p54_p0  ;;  %p851_p10 = por %p90_p8, %p60_p3 }
  0x11   : > { %109 = sbr.rel (%p1116_p11) target bundleno = 59 (0x3b), region = 20 }
  0x12   : > { %s1119_s22 = scalar_select %p851_p10, 1, 0 }
  0x18   : > { %112 = sbr.rel (!%p56_p5) target bundleno = 59 (0x3b), region = 24  ;;  %s113_s23 = sand.u32 (%p56_p5), 1, %s773_s13  }
  0x19   : > { %s571_s24 = sshll.u32 (%p56_p5), %s777_s14, 1  ;;  %s570_s25 = sshll.u32 (%p56_p5), %s113_s23, 6 }
  0x1a   : > { %s119_s26 = ssub.s32 (%p56_p5), 3, %s571_s24  ;;  %s863_s29 = scalar_lea.sflag (%p56_p5), [#allocation4], %s113_s23 }
  0x1b   : > { %p120_p12 = scmp.lt.s32.totalorder (%p56_p5), %s119_s26, 2  ;;  %s117_s30 = scalar_lea.vmem (%p56_p5), [#allocation3], %s570_s25 }
  0x1f   : > { %s1127_s26 = smov (!%p120_p12, %s119_s26), 2 }
  0x20   : > { %s860_s27 = sshll.u32 %s1127_s26, 9 }
  0x21   : > { %s125_s28 = ssub.s32 1024, %s860_s27 }
  0x22   : > { %126 = vsyncadd %s863_s29, %s125_s28  ;;  %p574_p13 = scmp.ne.s32.totalorder %s860_s27, 0  ;;  %s636_s3 = sshll.u32 %s777_s14, 10 }
  0x23   : > { %s871_s6 = scalar_lea.hbm %s1114_s1, %s636_s3  ;;  %s132_s7 = sshll.u32 %s117_s30, 4  ;;  %s873_s7 = int_to_ptr.vmem [resolvable:$true] %s132_s7 }
  0x24   : > { %s683_s8 = scalar_lea.hbm %s871_s6, %s860_s27  ;;  %s687_s15 = scalar_lea.hbm %s1114_s1, 1536 }
  0x25   : > { %p684_p0 = scmp.ne.s32.totalorder %s871_s6, %s683_s8  ;;  %p688_p3 = scmp.lt.u32.totalorder %s871_s6, %s1114_s1 }
  0x26   : > { %p689_p4 = scmp.lt.u32.totalorder %s687_s15, %s683_s8  ;;  %p691_p7 = scmp.lt.u32.totalorder %s683_s8, %s871_s6 }
  0x27   : > { %p685_p1 = pnand %p684_p0, %p574_p13 }
  0x28   : > { %p690_p5 = por %p689_p4, %p688_p3 }
  0x29   : > { %p686_p2 = pneg %p685_p1 }
  0x2a   : > { %p692_p8 = por %p691_p7, %p690_p5 }
  0x2c   : > { %p693_p12 = pnand %p692_p8, %p686_p2 }
  0x2e   : > { %696 = shalt.err (!%p693_p12)
}
  0x2f   : > { %s697_s23 = scalar_lea.vmem %s873_s7, %s860_s27  ;;  %s779_s24 = smov [#allocation3]  }
  0x30   : > { %p698_p0 = scmp.ne.s32.totalorder %s873_s7, %s697_s23  ;;  %s701_s25 = sshll.u32 %s779_s24, 4  ;;  %s702_s25 = int_to_ptr.vmem [resolvable:$false] %s701_s25 }
  0x31   : > { %s703_s26 = scalar_lea.vmem %s702_s25, 2048  ;;  %p704_p10 = scmp.lt.s32.totalorder %s873_s7, %s702_s25 }
  0x32   : > { %p699_p1 = pnand %p698_p0, %p574_p13  ;;  %p705_p3 = scmp.lt.s32.totalorder %s703_s26, %s697_s23 }
  0x34   : > { %p700_p11 = pneg %p699_p1  ;;  %p706_p4 = por %p705_p3, %p704_p10 }
  0x36   : > { %p707_p5 = pnand %p706_p4, %p700_p11 }
  0x38   : > { %710 = shalt.err (!%p707_p5)
}
  0x39   : > { %s780_s28 = smov 512   ;;  %s781_s30 = smov 32  }
  0x3a   : > { %138 = dma.hbm_to_vmem [thread:$0]  (%p574_p13), %s871_s6, %s860_s27, %s873_s7, %s863_s29, %s780_s28, %s780_s28, %s781_s30  }
  0x3b PF: > { %p579_p2 = scmp.ge.s32.totalorder %s777_s14, 1  ;;  %p140_p7 = scmp.lt.s32.totalorder %s777_s14, 3 }
  0x3d   : > { %p141_p8 = pnand %p579_p2, %p140_p7 }
  0x3e   : > { %s903_s3 = sand.u32 (!%p141_p8), 1, %s769_s12  }
  0x3f   : > { %144 = sbr.rel (%p141_p8) target bundleno = 181 (0xb5), region = 28  ;;  %s580_s4 = sshll.u32 (!%p141_p8), %s903_s3, 6 }
  0x40   : > { %s147_s5 = scalar_lea.sflag (!%p141_p8), [#allocation4], %s903_s3  ;;  %s909_s8 = scalar_lea.vmem (!%p141_p8), [#allocation3], %s580_s4 }
  0x46   : > { %756 = dma.done.wait (%p842_p6), %s147_s5, 1024  }
  0x47   : > { %758 = vsyncadd (%p842_p6), %s147_s5, 4294966272  ;;  %s582_s27 = sshll.u32 %s824_s0, 13  ;;  %v186_v0 = vlaneseq  ;;  %s183_s29 = sld [smem:[#allocation2]]  ;;  %v928_v8 = vld [vmem:[%s909_s8] sm:$0xff]  ;;  %v931_v9 = vld [vmem:[%s909_s8 + $0x8] sm:$0xff] }
  0x48   : > { %v918_v3 = vstv %s582_s27  ;;  %v336_v12 = vxor.u32 4294967295, %v928_v8  ;;  %v591_v13 = vadd.s32 4278124287, %v928_v8  ;;  %v941_v15 = vld [vmem:[%s909_s8 + $0x10] sm:$0xff]  ;;  %v337_v17 = vxor.u32 4294967295, %v931_v9  ;;  %v967_v63 = vld [vmem:[%s909_s8 + $0x18] sm:$0xff] }
  0x49   : > { %v187_v1 = vshrl.u32 %v186_v0, 7  ;;  %v916_v2 = vand.u32 127, %v186_v0  ;;  %v592_v18 = vadd.s32 4278124287, %v931_v9  ;;  %v338_v27 = vxor.u32 4294967295, %v941_v15  ;;  %s1014_s6 = scalar_lea.vmem [#allocation6], %s580_s4 }
  0x4a   : > { %v599_v21 = vandn.u32 %v591_v13, %v928_v8  ;;  %v607_v22 = vadd.s32 4278124287, %v336_v12  ;;  %v608_v25 = vadd.s32 4278124287, %v337_v17  ;;  %v593_v35 = vadd.s32 4278124287, %v941_v15 }
  0x4b   : > { %v194_v4 = vmul.u32 512, %v187_v1  ;;  %v921_v5 = vadd.s32 128, %v916_v2  ;;  %v924_v6 = vadd.s32 256, %v916_v2  ;;  %v934_v10 = vadd.s32 384, %v916_v2  ;;  %s473_s7 = scalar_lea.sflag [#allocation5], %s903_s3  ;;  %s624_s9 = sshll.u32 (%p847_p9), %s824_s0, 1 }
  0x4c   : > { %v600_v24 = vandn.u32 %v592_v18, %v931_v9  ;;  %v360_v29 = vand.u32 2155905152, %v599_v21  ;;  %v392_v30 = vand.u32 %v607_v22, %v928_v8  ;;  %v393_v33 = vand.u32 %v608_v25, %v931_v9  ;;  %s481_s10 = ssub.s32 (%p847_p9), 3, %s624_s9 }
  0x4d   : > { %v197_v7 = vadd.s32 %v918_v3, %v194_v4  ;;  %s184_s20 = smul.u32 2654435769, %s183_s29  ;;  %v601_v43 = vandn.u32 %v593_v35, %v941_v15  ;;  %v609_v46 = vadd.s32 4278124287, %v338_v27  ;;  %v188_v47 = vadd.s32 8, %v187_v1  ;;  %p482_p6 = scmp.lt.s32.totalorder (%p847_p9), %s481_s10, 2 }
  0x4e   : > { %v361_v32 = vand.u32 2155905152, %v600_v24  ;;  %v368_v37 = vshrl.u32 %v360_v29, 7  ;;  %v400_v38 = vand.u32 2155905152, %v392_v30 }
  0x4f   : > { %v199_v11 = vadd.s32 %v197_v7, %v916_v2  ;;  %v200_v14 = vadd.s32 %v197_v7, %v921_v5  ;;  %v943_v16 = vstv %s184_s20  ;;  %v201_v19 = vadd.s32 %v197_v7, %v924_v6 }
  0x50   : > { %v369_v40 = vshrl.u32 %v361_v32, 7  ;;  %v401_v41 = vand.u32 2155905152, %v393_v33  ;;  %v408_v45 = vshrl.u32 %v400_v38, 7  ;;  %v958_v48 = vmul.u32 255, %v368_v37 }
  0x51   : > { %v208_v20 = vadd.s32 %v943_v16, %v199_v11  ;;  %v209_v23 = vadd.s32 %v943_v16, %v200_v14  ;;  %v210_v26 = vadd.s32 %v943_v16, %v201_v19  ;;  %v362_v51 = vand.u32 2155905152, %v601_v43 }
  0x52   : > { %v409_v50 = vshrl.u32 %v401_v41, 7  ;;  %v416_v53 = vmul.u32 255, %v408_v45  ;;  %v394_v55 = vand.u32 %v609_v46, %v941_v15  ;;  %v961_v57 = vmul.u32 255, %v369_v40 }
  0x53   : > { %v216_v28 = vshrl.u32 %v208_v20, 16  ;;  %v217_v31 = vshrl.u32 %v209_v23, 16  ;;  %v218_v34 = vshrl.u32 %v210_v26, 16  ;;  %v202_v59 = vadd.s32 %v197_v7, %v934_v10 }
  0x54   : > { %v963_v58 = vmul.u32 255, %v409_v50  ;;  %v402_v62 = vand.u32 2155905152, %v394_v55  ;;  %v195_v4 = vmul.u32 512, %v188_v47  ;;  %v424_v12 = vor.u32 %v416_v53, %v958_v48 }
  0x55   : > { %v224_v36 = vxor.u32 %v216_v28, %v208_v20  ;;  %v225_v39 = vxor.u32 %v217_v31, %v209_v23  ;;  %v226_v42 = vxor.u32 %v218_v34, %v210_v26  ;;  %v211_v1 = vadd.s32 %v943_v16, %v202_v59 }
  0x56   : > { %v370_v14 = vshrl.u32 %v362_v51, 7  ;;  %v425_v18 = vor.u32 %v963_v58, %v961_v57  ;;  %v339_v7 = vxor.u32 4294967295, %v967_v63  ;;  %v410_v22 = vshrl.u32 %v402_v62, 7 }
  0x57   : > { %v232_v44 = vmul.u32 2246822507, %v224_v36  ;;  %v233_v49 = vmul.u32 2246822507, %v225_v39  ;;  %v219_v19 = vshrl.u32 %v211_v1, 16  ;;  %v976_v27 = vadd.s32 %v918_v3, %v195_v4  ;;  %v985_v36 = vld [vmem:[%s909_s8 + $0x20] sm:$0xff] }
  0x58   : > { %v234_v54 = vmul.u32 2246822507, %v226_v42  ;;  %v594_v23 = vadd.s32 4278124287, %v967_v63  ;;  %v610_v26 = vadd.s32 4278124287, %v339_v7  ;;  %v615_v45 = vandn.u32 %v928_v8, %v424_v12 }
  0x59   : > { %v240_v52 = vshrl.u32 %v232_v44, 13  ;;  %v241_v56 = vshrl.u32 %v233_v49, 13  ;;  %v227_v25 = vxor.u32 %v219_v19, %v211_v1  ;;  %v978_v30 = vmul.u32 255, %v370_v14 }
  0x5a   : > { %v242_v61 = vshrl.u32 %v234_v54, 13  ;;  %v602_v31 = vandn.u32 %v594_v23, %v967_v63  ;;  %v395_v34 = vand.u32 %v610_v26, %v967_v63  ;;  %v203_v35 = vadd.s32 %v976_v27, %v916_v2 }
  0x5b   : > { %v248_v60 = vxor.u32 %v240_v52, %v232_v44  ;;  %v249_v0 = vxor.u32 %v241_v56, %v233_v49  ;;  %v235_v33 = vmul.u32 2246822507, %v227_v25  ;;  %v418_v39 = vmul.u32 255, %v410_v22 }
  0x5c   : > { %v250_v13 = vxor.u32 %v242_v61, %v234_v54  ;;  %v363_v3 = vand.u32 2155905152, %v602_v31  ;;  %v403_v42 = vand.u32 2155905152, %v395_v34  ;;  %v212_v43 = vadd.s32 %v943_v16, %v203_v35  ;;  %v1001_v35 = vld [vmem:[%s909_s8 + $0x28] sm:$0xff] }
  0x5d   : > { %v256_v11 = vmul.u32 3266489909, %v248_v60  ;;  %v257_v17 = vmul.u32 3266489909, %v249_v0  ;;  %v243_v41 = vshrl.u32 %v235_v33, 13  ;;  %v340_v47 = vxor.u32 4294967295, %v985_v36 }
  0x5e   : > { %v258_v21 = vmul.u32 3266489909, %v250_v13  ;;  %v371_v2 = vshrl.u32 %v363_v3, 7  ;;  %v220_v51 = vshrl.u32 %v212_v43, 16  ;;  %v411_v54 = vshrl.u32 %v403_v42, 7 }
  0x5f   : > { %v264_v20 = vshrl.u32 %v256_v11, 16  ;;  %v265_v24 = vshrl.u32 %v257_v17, 16  ;;  %v251_v50 = vxor.u32 %v243_v41, %v235_v33  ;;  %v595_v55 = vadd.s32 4278124287, %v985_v36 }
  0x60   : > { %v266_v29 = vshrl.u32 %v258_v21, 16  ;;  %v426_v58 = vor.u32 %v418_v39, %v978_v30  ;;  %v228_v60 = vxor.u32 %v220_v51, %v212_v43  ;;  %v611_v0 = vadd.s32 4278124287, %v340_v47 }
  0x61   : > { %v272_v28 = vxor.u32 %v264_v20, %v256_v11  ;;  %v273_v32 = vxor.u32 %v265_v24, %v257_v17  ;;  %v259_v59 = vmul.u32 3266489909, %v251_v50  ;;  %v603_v8 = vandn.u32 %v595_v55, %v985_v36 }
  0x62   : > { %v274_v38 = vxor.u32 %v266_v29, %v258_v21  ;;  %v993_v11 = vmul.u32 255, %v371_v2  ;;  %v236_v12 = vmul.u32 2246822507, %v228_v60  ;;  %v396_v19 = vand.u32 %v611_v0, %v985_v36 }
  0x63   : > { %v280_v37 = vxor.u32 4294967295, %v272_v28  ;;  %v281_v40 = vxor.u32 4294967295, %v273_v32  ;;  %v267_v4 = vshrl.u32 %v259_v59, 16  ;;  %v419_v17 = vmul.u32 255, %v411_v54 }
  0x64   : > { %v282_v46 = vxor.u32 4294967295, %v274_v38  ;;  %v616_v20 = vandn.u32 %v931_v9, %v425_v18  ;;  %v244_v22 = vshrl.u32 %v236_v12, 13  ;;  %v617_v25 = vandn.u32 %v941_v15, %v426_v58 }
  0x65   : > { %v583_v44 = vadd.s32 4278124287, %v280_v37  ;;  %v584_v49 = vadd.s32 4278124287, %v281_v40  ;;  %v275_v21 = vxor.u32 %v267_v4, %v259_v59  ;;  %v364_v26 = vand.u32 2155905152, %v603_v8 }
  0x66   : > { %v585_v53 = vadd.s32 4278124287, %v282_v46  ;;  %v252_v33 = vxor.u32 %v244_v22, %v236_v12  ;;  %v204_v34 = vadd.s32 %v976_v27, %v921_v5  ;;  %v427_v9 = vor.u32 %v419_v17, %v993_v11  ;;  %v1010_v46 = vld [vmem:[%s909_s8 + $0x30] sm:$0xff] }
  0x67   : > { %v296_v52 = vand.u32 %v583_v44, %v272_v28  ;;  %v297_v56 = vand.u32 %v584_v49, %v273_v32  ;;  %v283_v31 = vxor.u32 4294967295, %v275_v21  ;;  %v404_v18 = vand.u32 2155905152, %v396_v19 }
  0x68   : > { %v298_v62 = vand.u32 %v585_v53, %v274_v38  ;;  %v260_v3 = vmul.u32 3266489909, %v252_v33  ;;  %v372_v5 = vshrl.u32 %v364_v26, 7  ;;  %v341_v42 = vxor.u32 4294967295, %v1001_v35 }
  0x69   : > { %v304_v61 = vand.u32 2155905152, %v296_v52  ;;  %v305_v1 = vand.u32 2155905152, %v297_v56  ;;  %v586_v15 = vadd.s32 4278124287, %v283_v31  ;;  %v205_v51 = vadd.s32 %v976_v27, %v924_v6 }
  0x6a   : > { %v306_v14 = vand.u32 2155905152, %v298_v62  ;;  %v268_v44 = vshrl.u32 %v260_v3, 16  ;;  %v612_v47 = vadd.s32 4278124287, %v341_v42  ;;  %v618_v52 = vandn.u32 %v967_v63, %v427_v9 }
  0x6b   : > { %v312_v13 = vshrl.u32 %v304_v61, 7  ;;  %v313_v7 = vshrl.u32 %v305_v1, 7  ;;  %v342_v53 = vxor.u32 4294967295, %v1010_v46  ;;  %v214_v58 = vadd.s32 %v943_v16, %v205_v51 }
  0x6c   : > { %v314_v24 = vshrl.u32 %v306_v14, 7  ;;  %v276_v50 = vxor.u32 %v268_v44, %v260_v3  ;;  %v380_v59 = vmul.u32 255, %v372_v5  ;;  %v397_v62 = vand.u32 %v612_v47, %v1001_v35 }
  0x6d   : > { %v320_v23 = vsub.s32 %v272_v28, %v312_v13  ;;  %v321_v29 = vsub.s32 %v273_v32, %v313_v7  ;;  %v213_v32 = vadd.s32 %v943_v16, %v204_v34  ;;  %v222_v1 = vshrl.u32 %v214_v58, 16 }
  0x6e   : > { %v322_v39 = vsub.s32 %v274_v38, %v314_v24  ;;  %v284_v55 = vxor.u32 4294967295, %v276_v50  ;;  %v597_v63 = vadd.s32 4278124287, %v1010_v46  ;;  %v613_v4 = vadd.s32 4278124287, %v342_v53 }
  0x6f   : > { %v448_v37 = vand.u32 %v958_v48, %v320_v23  ;;  %v449_v28 = vand.u32 %v961_v57, %v321_v29  ;;  %v299_v48 = vand.u32 %v586_v15, %v275_v21  ;;  %v221_v38 = vshrl.u32 %v213_v32, 16  ;;  %v1032_v23 = vld [vmem:[%s909_s8 + $0x38] sm:$0xff] }
  0x70   : > { %v450_v41 = vand.u32 %v978_v30, %v322_v39  ;;  %v596_v30 = vadd.s32 4278124287, %v1001_v35  ;;  %v587_v0 = vadd.s32 4278124287, %v284_v55  ;;  %v206_v12 = vadd.s32 %v976_v27, %v934_v10 }
  0x71   : > { %v456_v40 = vor.u32 %v615_v45, %v448_v37  ;;  %v457_v43 = vor.u32 %v616_v20, %v449_v28  ;;  %v412_v45 = vshrl.u32 %v404_v18, 7  ;;  %v307_v49 = vand.u32 2155905152, %v299_v48 }
  0x72   : > { %v458_v57 = vor.u32 %v617_v25, %v450_v41  ;;  %v229_v2 = vxor.u32 %v221_v38, %v213_v32  ;;  %v604_v61 = vandn.u32 %v596_v30, %v1001_v35  ;;  %v300_v14 = vand.u32 %v587_v0, %v276_v50 }
  0x73   : > { %464 = vst [vmem:[%s1014_s6] sm:$0xff] %v456_v40  ;;  %465 = vst [vmem:[%s1014_s6 + $0x8] sm:$0xff] %v457_v43  ;;  %v315_v54 = vshrl.u32 %v307_v49, 7  ;;  %v420_v60 = vmul.u32 255, %v412_v45  ;;  %v230_v19 = vxor.u32 %v222_v1, %v214_v58  ;;  %v405_v22 = vand.u32 2155905152, %v397_v62 }
  0x74   : > { %466 = vst [vmem:[%s1014_s6 + $0x10] sm:$0xff] %v458_v57  ;;  %v237_v56 = vmul.u32 2246822507, %v229_v2  ;;  %v365_v20 = vand.u32 2155905152, %v604_v61  ;;  %v605_v29 = vandn.u32 %v597_v63, %v1010_v46  ;;  %v398_v31 = vand.u32 %v613_v4, %v1010_v46 }
  0x75   : > { %v323_v8 = vsub.s32 %v275_v21, %v315_v54  ;;  %v428_v7 = vor.u32 %v420_v60, %v380_v59  ;;  %v308_v24 = vand.u32 2155905152, %v300_v14  ;;  %v238_v26 = vmul.u32 2246822507, %v230_v19 }
  0x76   : > { %v245_v6 = vshrl.u32 %v237_v56, 13  ;;  %v215_v10 = vadd.s32 %v943_v16, %v206_v12  ;;  %v343_v34 = vxor.u32 4294967295, %v1032_v23  ;;  %v373_v39 = vshrl.u32 %v365_v20, 7 }
  0x77   : > { %v451_v13 = vand.u32 %v993_v11, %v323_v8  ;;  %v316_v27 = vshrl.u32 %v308_v24, 7  ;;  %v246_v33 = vshrl.u32 %v238_v26, 13  ;;  %v619_v37 = vandn.u32 %v985_v36, %v428_v7 }
  0x78   : > { %v253_v17 = vxor.u32 %v245_v6, %v237_v56  ;;  %v223_v9 = vshrl.u32 %v215_v10, 16  ;;  %v413_v15 = vshrl.u32 %v405_v22, 7  ;;  %v366_v32 = vand.u32 2155905152, %v605_v29 }
  0x79   : > { %v459_v21 = vor.u32 %v618_v52, %v451_v13  ;;  %v324_v18 = vsub.s32 %v276_v50, %v316_v27  ;;  %v254_v3 = vxor.u32 %v246_v33, %v238_v26  ;;  %v598_v41 = vadd.s32 4278124287, %v1032_v23 }
  0x7a   : > { %v261_v25 = vmul.u32 3266489909, %v253_v17  ;;  %v231_v40 = vxor.u32 %v223_v9, %v215_v10  ;;  %v614_v16 = vadd.s32 4278124287, %v343_v34  ;;  %v406_v48 = vand.u32 2155905152, %v398_v31 }
  0x7b   : > { %467 = vst [vmem:[%s1014_s6 + $0x18] sm:$0xff] %v459_v21  ;;  %v452_v5 = vand.u32 %v380_v59, %v324_v18  ;;  %v262_v43 = vmul.u32 3266489909, %v254_v3  ;;  %v381_v44 = vmul.u32 255, %v373_v39  ;;  %v606_v49 = vandn.u32 %v598_v41, %v1032_v23 }
  0x7c   : > { %v269_v11 = vshrl.u32 %v261_v25, 16  ;;  %v239_v38 = vmul.u32 2246822507, %v231_v40  ;;  %v421_v45 = vmul.u32 255, %v413_v15  ;;  %v399_v50 = vand.u32 %v614_v16, %v1032_v23 }
  0x7d   : > { %v460_v57 = vor.u32 %v619_v37, %v452_v5  ;;  %v270_v30 = vshrl.u32 %v262_v43, 16  ;;  %v374_v52 = vshrl.u32 %v366_v32, 7  ;;  %v414_v53 = vshrl.u32 %v406_v48, 7 }
  0x7e   : > { %v277_v28 = vxor.u32 %v269_v11, %v261_v25  ;;  %v247_v47 = vshrl.u32 %v239_v38, 13  ;;  %v429_v56 = vor.u32 %v421_v45, %v381_v44  ;;  %v367_v60 = vand.u32 2155905152, %v606_v49 }
  0x7f   : > { %468 = vst [vmem:[%s1014_s6 + $0x20] sm:$0xff] %v460_v57  ;;  %v278_v51 = vxor.u32 %v270_v30, %v262_v43  ;;  %v407_v61 = vand.u32 2155905152, %v399_v50  ;;  %v382_v0 = vmul.u32 255, %v374_v52  ;;  %v422_v6 = vmul.u32 255, %v414_v53 }
  0x80   : > { %v285_v42 = vxor.u32 4294967295, %v277_v28  ;;  %v255_v54 = vxor.u32 %v247_v47, %v239_v38  ;;  %v620_v4 = vandn.u32 %v1001_v35, %v429_v56  ;;  %v375_v14 = vshrl.u32 %v367_v60, 7 }
  0x81   : > { %v286_v58 = vxor.u32 4294967295, %v278_v51  ;;  %v415_v17 = vshrl.u32 %v407_v61, 7  ;;  %v430_v20 = vor.u32 %v422_v6, %v382_v0 }
  0x82   : > { %v588_v36 = vadd.s32 4278124287, %v285_v42  ;;  %v263_v59 = vmul.u32 3266489909, %v255_v54  ;;  %v383_v26 = vmul.u32 255, %v375_v14 }
  0x83   : > { %v589_v8 = vadd.s32 4278124287, %v286_v58  ;;  %v423_v29 = vmul.u32 255, %v415_v17  ;;  %v621_v35 = vandn.u32 %v1010_v46, %v430_v20 }
  0x84   : > { %v301_v2 = vand.u32 %v588_v36, %v277_v28  ;;  %v271_v1 = vshrl.u32 %v263_v59, 16 }
  0x85   : > { %v302_v12 = vand.u32 %v589_v8, %v278_v51  ;;  %v431_v33 = vor.u32 %v423_v29, %v383_v26 }
  0x86   : > { %v309_v55 = vand.u32 2155905152, %v301_v2  ;;  %v279_v13 = vxor.u32 %v271_v1, %v263_v59 }
  0x87   : > { %v310_v7 = vand.u32 2155905152, %v302_v12  ;;  %v622_v9 = vandn.u32 %v1032_v23, %v431_v33 }
  0x88   : > { %v317_v62 = vshrl.u32 %v309_v55, 7  ;;  %v287_v22 = vxor.u32 4294967295, %v279_v13 }
  0x89   : > { %v318_v24 = vshrl.u32 %v310_v7, 7 }
  0x8a   : > { %v325_v63 = vsub.s32 %v277_v28, %v317_v62  ;;  %v590_v25 = vadd.s32 4278124287, %v287_v22 }
  0x8b   : > { %v326_v31 = vsub.s32 %v278_v51, %v318_v24 }
  0x8c   : > { %v453_v19 = vand.u32 %v381_v44, %v325_v63  ;;  %v303_v10 = vand.u32 %v590_v25, %v279_v13 }
  0x8d   : > { %v454_v27 = vand.u32 %v382_v0, %v326_v31 }
  0x8e   : > { %v461_v21 = vor.u32 %v620_v4, %v453_v19  ;;  %v311_v11 = vand.u32 2155905152, %v303_v10 }
  0x8f   : > { %v462_v34 = vor.u32 %v621_v35, %v454_v27 }
  0x90   : > { %469 = vst [vmem:[%s1014_s6 + $0x28] sm:$0xff] %v461_v21  ;;  %v319_v37 = vshrl.u32 %v311_v11, 7 }
  0x91   : > { %470 = vst [vmem:[%s1014_s6 + $0x30] sm:$0xff] %v462_v34 }
  0x92   : > { %v327_v39 = vsub.s32 %v279_v13, %v319_v37  ;;  %479 = sbr.rel (!%p847_p9) target bundleno = 181 (0xb5), region = 36 }
  0x94   : > { %v455_v18 = vand.u32 %v383_v26, %v327_v39 }
  0x96   : > { %v463_v28 = vor.u32 %v622_v9, %v455_v18 }
  0x98   : > { %471 = vst [vmem:[%s1014_s6 + $0x38] sm:$0xff] %v463_v28 }
  0x99   : > { %s1129_s10 = smov (!%p482_p6, %s481_s10), 2 }
  0x9a   : > { %s1054_s15 = sshll.u32 %s1129_s10, 9 }
  0x9b   : > { %s487_s17 = ssub.s32 1024, %s1054_s15 }
  0x9c   : > { %488 = vsyncadd %s473_s7, %s487_s17  ;;  %p627_p10 = scmp.ne.s32.totalorder %s1054_s15, 0  ;;  %s639_s21 = sshll.u32 %s824_s0, 10 }
  0x9d   : > { %s1064_s24 = scalar_lea.hbm %s1115_s2, %s639_s21  ;;  %s494_s25 = sshll.u32 %s1014_s6, 4  ;;  %s1067_s25 = int_to_ptr.vmem [resolvable:$true] %s494_s25 }
  0x9e   : > { %s711_s26 = scalar_lea.vmem %s1067_s25, %s1054_s15  ;;  %s782_s28 = smov [#allocation6]  }
  0x9f   : > { %p712_p9 = scmp.ne.s32.totalorder %s1067_s25, %s711_s26  ;;  %s715_s30 = sshll.u32 %s782_s28, 4  ;;  %s716_s30 = int_to_ptr.vmem [resolvable:$false] %s715_s30 }
  0xa0   : > { %s717_s0 = scalar_lea.vmem %s716_s30, 2048  ;;  %p718_p12 = scmp.lt.s32.totalorder %s1067_s25, %s716_s30 }
  0xa1   : > { %p713_p11 = pnand %p712_p9, %p627_p10  ;;  %p719_p0 = scmp.lt.s32.totalorder %s717_s0, %s711_s26 }
  0xa3   : > { %p714_p13 = pneg %p713_p11  ;;  %p720_p1 = por %p719_p0, %p718_p12 }
  0xa5   : > { %p721_p3 = pnand %p720_p1, %p714_p13 }
  0xa7   : > { %724 = shalt.err (!%p721_p3)
}
  0xa8   : > { %s725_s4 = scalar_lea.hbm %s1064_s24, %s1054_s15  ;;  %s729_s27 = scalar_lea.hbm %s1115_s2, 1536 }
  0xa9   : > { %p726_p4 = scmp.ne.s32.totalorder %s1064_s24, %s725_s4  ;;  %p730_p7 = scmp.lt.u32.totalorder %s1064_s24, %s1115_s2 }
  0xaa   : > { %p731_p8 = scmp.lt.u32.totalorder %s729_s27, %s725_s4  ;;  %p733_p9 = scmp.lt.u32.totalorder %s725_s4, %s1064_s24 }
  0xab   : > { %p727_p5 = pnand %p726_p4, %p627_p10 }
  0xac   : > { %p732_p6 = por %p731_p8, %p730_p7 }
  0xad   : > { %p728_p2 = pneg %p727_p5 }
  0xae   : > { %p734_p11 = por %p733_p9, %p732_p6 }
  0xb0   : > { %p735_p13 = pnand %p734_p11, %p728_p2 }
  0xb2   : > { %738 = shalt.err (!%p735_p13)
}
  0xb3   : > { %s783_s6 = smov 512   ;;  %s784_s9 = smov 32  }
  0xb4   : > { %500 = dma.vmem_to_hbm [thread:$0]  (%p627_p10), %s1067_s25, %s1054_s15, %s1064_s24, %s473_s7, %s783_s6, %s783_s6, %s784_s9  }
  0xb5 PF: > { %s509_s10 = sand.u32 1, %s765_s11   ;;  %p1120_p12 = scmp.ne.s32.totalorder %s1119_s22, 0 }
  0xb6   : > { %p1121_p0 = scmp.ge.s32.totalorder %s777_s14, 2  ;;  %s510_s17 = scalar_lea.sflag [#allocation5], %s509_s10 }
  0xb8   : > { %p643_p1 = pnand %p1121_p0, %p1120_p12 }
  0xba   : > { %760 = dma.done.wait (!%p643_p1), %s510_s17, 1024  }
  0xbb   : > { %762 = vsyncadd (!%p643_p1), %s510_s17, 4294966272  ;;  %p16_p3 = scmp.ge.s32.totalorder %s828_s16, 4   ;;  %s1122_s11 = smov %s769_s12 }
  0xbc   : > { %s1123_s12 = smov %s773_s13  ;;  %s1124_s13 = smov %s840_s19 }
  0xbd   : > { %s1125_s14 = smov %s828_s16  ;;  %18 = sbr.rel (!%p16_p3) target bundleno = 7 (0x7), region = 73 }
  0xc4   :  { %515 = vsyncpa [#allocation4], 1 }
  0xc5   :  { %517 = vsyncpa [#allocation4 + $0x1], 1 }
  0xc6   :  { %518 = vsyncpa [#allocation5], 1 }
  0xc7   :  { %520 = vsyncpa [#allocation5 + $0x1], 1 }

</bundles_post_ra>
